<compile_context>
chip_gen: v7x
topology: tpu7x:2x2x1
jax: 0.10.0
libtpu: 0.0.40
codegen_flags: <defaults>
</compile_context>

<pallas_src>
import jax
import jax.numpy as jnp
from jax.experimental import pallas as pl
from jax.experimental.pallas import tpu as pltpu
from jax.scipy.linalg import block_diag


# ----------------------------- config ---------------------------------------
STATE_SIZE = 4
ACTION_SIZE = 3
REWARD_SIZE = 1
ENSEMBLE_SIZE = 2
HIDDEN_SIZE = 32
HIDDEN_LAYER_NUM = 5          # 4 swish-activated hidden layers + 1 output layer
BATCH = 8

IN_DIM = STATE_SIZE + ACTION_SIZE
OUTPUT_DIM = STATE_SIZE + REWARD_SIZE    # mean/logvar dim
OUT2 = OUTPUT_DIM * 2                    # last layer emits [mean | logvar_raw]

N_HIDDEN = HIDDEN_LAYER_NUM - 1          # number of swish layers (4)
FPAD = ENSEMBLE_SIZE * HIDDEN_SIZE       # packed feature width (64)
HALF = FPAD // 2                         # logvar-head column offset (32)
EOUT = ENSEMBLE_SIZE * OUTPUT_DIM        # packed mean/var width (10)

N_LAYERS = N_HIDDEN + 1                  # weight slabs: hidden..., merged head
N_AUX = N_HIDDEN + 3                     # hidden biases..., head bias, max_lv, min_lv
N_AUX_PAD = 8                            # pad sublane dim of aux to 8

MATMUL_DTYPE = jnp.bfloat16              # MXU-native on v5e/v6e/v7x; f32 accumulation

assert ENSEMBLE_SIZE * IN_DIM <= FPAD
assert EOUT <= HALF
assert N_AUX <= N_AUX_PAD


def _round_up(n, m):
    return ((n + m - 1) // m) * m


# ----------------------------- kernel ---------------------------------------
def ensemble_model_kernel(x_ref, w_ref, aux_ref, out_ref):
    # x_ref:   (TILE_N, FPAD) bf16      packed activations (member e in cols
    #                                   e*IN_DIM:(e+1)*IN_DIM, zero-padded)
    # w_ref:   (N_LAYERS, FPAD, FPAD) bf16  block-diagonal weights:
    #            rows 0..N_HIDDEN-1: hidden layers
    #            row  N_HIDDEN     : merged head (mean cols e*OUT,
    #                                logvar cols HALF + e*OUT)
    # aux_ref: (N_AUX_PAD, FPAD) f32    hidden biases..., merged head bias,
    #                                   max_logvar row, min_logvar row, zero pad
    # out_ref: (TILE_N, 2*FPAD) f32     lanes 0:FPAD = head (mean in 0:EOUT),
    #                                   lanes FPAD:2*FPAD = var
    #                                   (meaningful in HALF:HALF+EOUT)
    h = x_ref[...]                                              # (TILE_N, FPAD) bf16

    for i in range(N_HIDDEN):                                   # unrolled, static
        z = jnp.dot(h, w_ref[i], preferred_element_type=jnp.float32)
        z = z + aux_ref[i:i + 1, :]                             # (1, FPAD) broadcast, f32
        z = z * jax.nn.sigmoid(z)                               # swish, f32
        h = z.astype(MATMUL_DTYPE)

    # single merged head matmul: mean in lanes 0:HALF, raw logvar in HALF:FPAD
    head = jnp.dot(h, w_ref[N_HIDDEN], preferred_element_type=jnp.float32)
    head = head + aux_ref[N_HIDDEN:N_HIDDEN + 1, :]             # (TILE_N, FPAD) f32

    max_lv = aux_ref[N_HIDDEN + 1:N_HIDDEN + 2, :]              # (1, FPAD)
    min_lv = aux_ref[N_HIDDEN + 2:N_HIDDEN + 3, :]
    # bounded softplus path on all lanes (mean lanes have zero bounds ->
    # result bounded and discarded by the wrapper slice)
    logvar = max_lv - jax.nn.softplus(max_lv - head)
    logvar = min_lv + jax.nn.softplus(logvar - min_lv)
    var = jnp.exp(logvar)                                       # ret_log_var=False path

    # one full-width lane-dense store (no masked sub-128 stores)
    out_ref[...] = jnp.concatenate([head, var], axis=-1)


# ----------------------------- param packing (run once when weights change) --
def pack_params(weights, biases, max_logvar, min_logvar):
    """Block-diagonal weight stack (bf16) + bias / logvar-bound stack (f32)."""
    E = ENSEMBLE_SIZE
    w_stack, aux_rows = [], []

    # hidden layers: block-diagonal (FPAD, FPAD) weights, (FPAD,) biases
    for i in range(N_HIDDEN):
        w = weights[i]                                   # (E, in_f, HIDDEN_SIZE)
        in_f = w.shape[1]
        blk = block_diag(*[w[e] for e in range(E)])      # (E*in_f, FPAD)
        blk = jnp.pad(blk, ((0, FPAD - E * in_f), (0, 0)))
        w_stack.append(blk)
        aux_rows.append(biases[i].reshape(-1))           # (E*HIDDEN,) == FPAD

    # merged output head: mean block-diag in cols 0:EOUT,
    # logvar block-diag in cols HALF:HALF+EOUT
    w_last, b_last = weights[-1], biases[-1]             # (E, H, 2*OUT), (E, 2*OUT)
    wm = block_diag(*[w_last[e, :, :OUTPUT_DIM] for e in range(E)])   # (FPAD, EOUT)
    wl = block_diag(*[w_last[e, :, OUTPUT_DIM:] for e in range(E)])   # (FPAD, EOUT)
    head_w = jnp.concatenate(
        [jnp.pad(wm, ((0, 0), (0, HALF - EOUT))),
         jnp.pad(wl, ((0, 0), (0, HALF - EOUT)))], axis=1)            # (FPAD, FPAD)
    w_stack.append(head_w)

    bm = jnp.pad(b_last[:, :OUTPUT_DIM].reshape(-1), (0, HALF - EOUT))
    bl = jnp.pad(b_last[:, OUTPUT_DIM:].reshape(-1), (0, HALF - EOUT))
    aux_rows.append(jnp.concatenate([bm, bl]))

    zeros_half = jnp.zeros((HALF,), jnp.float32)
    mx = jnp.pad(jnp.tile(max_logvar[0], E), (0, HALF - EOUT))
    mn = jnp.pad(jnp.tile(min_logvar[0], E), (0, HALF - EOUT))
    aux_rows.append(jnp.concatenate([zeros_half, mx]))
    aux_rows.append(jnp.concatenate([zeros_half, mn]))
    while len(aux_rows) < N_AUX_PAD:                      # pad sublane dim to 8
        aux_rows.append(jnp.zeros((FPAD,), jnp.float32))

    w_packed = jnp.stack(w_stack).astype(MATMUL_DTYPE)    # (N_LAYERS, FPAD, FPAD)
    aux_packed = jnp.stack(aux_rows).astype(jnp.float32)  # (N_AUX_PAD, FPAD)
    return w_packed, aux_packed


# ----------------------------- forward (single jit, packed params) -----------
@jax.jit
def ensemble_model_forward(x, w_packed, aux_packed):
    """x: (E, N, IN_DIM) f32.  Returns (mean, var), each (E, N, OUTPUT_DIM) f32."""
    E, N, in_dim = x.shape

    # pack ensemble into the lane dimension: (N, E*in_dim) zero-padded to FPAD
    xp = jnp.transpose(x, (1, 0, 2)).reshape(N, E * in_dim)
    xp = jnp.pad(xp, ((0, 0), (0, FPAD - E * in_dim))).astype(MATMUL_DTYPE)

    # parallel grid over N (both TensorCores on v7x once N is large);
    # TILE_N >= 512 amortizes per-grid-step overhead, toy N collapses to 1 step
    tile_n = min(_round_up(N, 8), 512)
    n_pad = _round_up(N, tile_n)
    if n_pad != N:
        xp = jnp.pad(xp, ((0, n_pad - N), (0, 0)))

    out = pl.pallas_call(
        ensemble_model_kernel,
        out_shape=jax.ShapeDtypeStruct((n_pad, 2 * FPAD), jnp.float32),
        grid=(n_pad // tile_n,),
        in_specs=[
            pl.BlockSpec((tile_n, FPAD), lambda i: (i, 0)),
            pl.BlockSpec((N_LAYERS, FPAD, FPAD), lambda i: (0, 0, 0)),
            pl.BlockSpec((N_AUX_PAD, FPAD), lambda i: (0, 0)),
        ],
        out_specs=pl.BlockSpec((tile_n, 2 * FPAD), lambda i: (i, 0)),
        compiler_params=pltpu.CompilerParams(dimension_semantics=("parallel",)),
    )(xp, w_packed, aux_packed)

    mean = out[:N, :EOUT]
    var = out[:N, FPAD + HALF:FPAD + HALF + EOUT]
    mean = jnp.transpose(mean.reshape(N, E, OUTPUT_DIM), (1, 0, 2))
    var = jnp.transpose(var.reshape(N, E, OUTPUT_DIM), (1, 0, 2))
    return mean, var
    # TODO(synk): MBPO-style rollouts should stack their many small calls along
    # N before calling this (one pallas_call) instead of calling per step.


# ----------------------------- param init ------------------------------------
def init_params(key):
    """Deterministic truncated-normal init matching init_weights()."""
    layer_dims = []
    for layer_i in range(HIDDEN_LAYER_NUM - 1):
        in_f = IN_DIM if layer_i == 0 else HIDDEN_SIZE
        layer_dims.append((in_f, HIDDEN_SIZE))
    layer_dims.append((HIDDEN_SIZE, OUT2))

    weights, biases = [], []
    for (in_f, out_f) in layer_dims:
        key, sub = jax.random.split(key)
        std = 1.0 / (2.0 * jnp.sqrt(jnp.float32(in_f)))
        w = std * jax.random.truncated_normal(
            sub, -2.0, 2.0, (ENSEMBLE_SIZE, in_f, out_f), dtype=jnp.float32)
        b = jnp.zeros((ENSEMBLE_SIZE, out_f), dtype=jnp.float32)
        weights.append(w)
        biases.append(b)

    max_logvar = jnp.ones((1, OUTPUT_DIM), jnp.float32) / 2.0
    min_logvar = -jnp.ones((1, OUTPUT_DIM), jnp.float32) * 10.0
    return weights, biases, max_logvar, min_logvar


# ----------------------------- reference (pure JAX) ---------------------------
def reference_forward(x, weights, biases, max_logvar, min_logvar):
    """Same math as the kernel: bf16 matmul operands, f32 accumulate + tail."""
    h = x
    for i, (w, b) in enumerate(zip(weights, biases)):
        z = jnp.einsum("eni,eio->eno",
                       h.astype(MATMUL_DTYPE), w.astype(MATMUL_DTYPE),
                       preferred_element_type=jnp.float32) + b[:, None, :]
        if i != len(weights) - 1:
            z = z * jax.nn.sigmoid(z)
        h = z
    mean = h[:, :, :OUTPUT_DIM]
    logvar = max_logvar - jax.nn.softplus(max_logvar - h[:, :, OUTPUT_DIM:])
    logvar = min_logvar + jax.nn.softplus(logvar - min_logvar)
    return mean, jnp.exp(logvar)


# ----------------------------- main -------------------------------------------
if __name__ == "__main__":
    key = jax.random.PRNGKey(0)
    key, xkey = jax.random.split(key)
    x = jax.random.normal(xkey, (ENSEMBLE_SIZE, BATCH, IN_DIM), dtype=jnp.float32)

    weights, biases, max_logvar, min_logvar = init_params(key)

    # pack once (hoisted out of the per-call forward path)
    w_packed, aux_packed = jax.block_until_ready(
        pack_params(weights, biases, max_logvar, min_logvar))

    mean, var = ensemble_model_forward(x, w_packed, aux_packed)
    jax.block_until_ready((mean, var))

    ref_mean, ref_var = reference_forward(x, weights, biases, max_logvar, min_logvar)
    assert mean.shape == (ENSEMBLE_SIZE, BATCH, OUTPUT_DIM)
    assert var.shape == (ENSEMBLE_SIZE, BATCH, OUTPUT_DIM)
    assert jnp.allclose(mean, ref_mean, atol=1e-4, rtol=1e-3), "mean mismatch"
    assert jnp.allclose(var, ref_var, atol=1e-4, rtol=1e-3), "var mismatch"

    print("KERNEL_OK")
</pallas_src>

<mosaic_0001>
module attributes {stable_mosaic.version = 11 : i64} {
  func.func @ensemble_model_kernel(%arg0: i32, %arg1: memref<8x64xbf16, #tpu.memory_space<vmem>>, %arg2: memref<5x64x64xbf16, #tpu.memory_space<vmem>>, %arg3: memref<8x64xf32, #tpu.memory_space<vmem>>, %arg4: memref<8x128xf32, #tpu.memory_space<vmem>>) attributes {dimension_semantics = [#tpu.dimension_semantics<parallel>], iteration_bounds = array<i64: 1>, scalar_prefetch = 0 : i64, scratch_operands = 0 : i64, tpu.core_type = #tpu.core_type<tc>, window_params = [{transform_indices = @transform_0, window_bounds = array<i64: 8, 64>}, {pipeline_mode = #tpu.pipeline_mode<synchronous>, transform_indices = @transform_1, window_bounds = array<i64: 5, 64, 64>}, {pipeline_mode = #tpu.pipeline_mode<synchronous>, transform_indices = @transform_2, window_bounds = array<i64: 8, 64>}, {transform_indices = @transform_3, window_bounds = array<i64: 8, 128>}]} {
    %c0 = arith.constant 0 : index
    %c0_0 = arith.constant 0 : index
    %0 = vector.load %arg1[%c0, %c0_0] : memref<8x64xbf16, #tpu.memory_space<vmem>>, vector<8x64xbf16>
    %c0_1 = arith.constant 0 : index
    %c0_2 = arith.constant 0 : index
    %c0_3 = arith.constant 0 : index
    %1 = vector.load %arg2[%c0_1, %c0_2, %c0_3] : memref<5x64x64xbf16, #tpu.memory_space<vmem>>, vector<1x64x64xbf16>
    %2 = vector.shape_cast %1 : vector<1x64x64xbf16> to vector<64x64xbf16>
    %cst = arith.constant dense<0.000000e+00> : vector<8x64xf32>
    %3 = tpu.matmul %0, %2, %cst {dimension_numbers = #tpu.dot_dimension_numbers<[1], [0], [0], [1], [0, 0, 1, 1], [], []>} : vector<8x64xbf16>, vector<64x64xbf16>, vector<8x64xf32> -> vector<8x64xf32>
    %c0_4 = arith.constant 0 : index
    %c0_5 = arith.constant 0 : index
    %4 = vector.load %arg3[%c0_4, %c0_5] : memref<8x64xf32, #tpu.memory_space<vmem>>, vector<1x64xf32>
    %5 = vector.broadcast %4 : vector<1x64xf32> to vector<8x64xf32>
    %6 = arith.addf %3, %5 : vector<8x64xf32>
    %7 = arith.negf %6 : vector<8x64xf32>
    %8 = math.exp %7 : vector<8x64xf32>
    %cst_6 = arith.constant 1.000000e+00 : f32
    %9 = vector.broadcast %cst_6 : f32 to vector<8x64xf32>
    %10 = arith.addf %9, %8 : vector<8x64xf32>
    %11 = arith.divf %9, %10 : vector<8x64xf32>
    %12 = arith.mulf %6, %11 : vector<8x64xf32>
    %13 = arith.truncf %12 : vector<8x64xf32> to vector<8x64xbf16>
    %c1 = arith.constant 1 : index
    %c0_7 = arith.constant 0 : index
    %c0_8 = arith.constant 0 : index
    %14 = vector.load %arg2[%c1, %c0_7, %c0_8] : memref<5x64x64xbf16, #tpu.memory_space<vmem>>, vector<1x64x64xbf16>
    %15 = vector.shape_cast %14 : vector<1x64x64xbf16> to vector<64x64xbf16>
    %cst_9 = arith.constant dense<0.000000e+00> : vector<8x64xf32>
    %16 = tpu.matmul %13, %15, %cst_9 {dimension_numbers = #tpu.dot_dimension_numbers<[1], [0], [0], [1], [0, 0, 1, 1], [], []>} : vector<8x64xbf16>, vector<64x64xbf16>, vector<8x64xf32> -> vector<8x64xf32>
    %c1_10 = arith.constant 1 : index
    %c0_11 = arith.constant 0 : index
    %17 = vector.load %arg3[%c1_10, %c0_11] : memref<8x64xf32, #tpu.memory_space<vmem>>, vector<1x64xf32>
    %18 = vector.broadcast %17 : vector<1x64xf32> to vector<8x64xf32>
    %19 = arith.addf %16, %18 : vector<8x64xf32>
    %20 = arith.negf %19 : vector<8x64xf32>
    %21 = math.exp %20 : vector<8x64xf32>
    %cst_12 = arith.constant 1.000000e+00 : f32
    %22 = vector.broadcast %cst_12 : f32 to vector<8x64xf32>
    %23 = arith.addf %22, %21 : vector<8x64xf32>
    %24 = arith.divf %22, %23 : vector<8x64xf32>
    %25 = arith.mulf %19, %24 : vector<8x64xf32>
    %26 = arith.truncf %25 : vector<8x64xf32> to vector<8x64xbf16>
    %c2 = arith.constant 2 : index
    %c0_13 = arith.constant 0 : index
    %c0_14 = arith.constant 0 : index
    %27 = vector.load %arg2[%c2, %c0_13, %c0_14] : memref<5x64x64xbf16, #tpu.memory_space<vmem>>, vector<1x64x64xbf16>
    %28 = vector.shape_cast %27 : vector<1x64x64xbf16> to vector<64x64xbf16>
    %cst_15 = arith.constant dense<0.000000e+00> : vector<8x64xf32>
    %29 = tpu.matmul %26, %28, %cst_15 {dimension_numbers = #tpu.dot_dimension_numbers<[1], [0], [0], [1], [0, 0, 1, 1], [], []>} : vector<8x64xbf16>, vector<64x64xbf16>, vector<8x64xf32> -> vector<8x64xf32>
    %c2_16 = arith.constant 2 : index
    %c0_17 = arith.constant 0 : index
    %30 = vector.load %arg3[%c2_16, %c0_17] : memref<8x64xf32, #tpu.memory_space<vmem>>, vector<1x64xf32>
    %31 = vector.broadcast %30 : vector<1x64xf32> to vector<8x64xf32>
    %32 = arith.addf %29, %31 : vector<8x64xf32>
    %33 = arith.negf %32 : vector<8x64xf32>
    %34 = math.exp %33 : vector<8x64xf32>
    %cst_18 = arith.constant 1.000000e+00 : f32
    %35 = vector.broadcast %cst_18 : f32 to vector<8x64xf32>
    %36 = arith.addf %35, %34 : vector<8x64xf32>
    %37 = arith.divf %35, %36 : vector<8x64xf32>
    %38 = arith.mulf %32, %37 : vector<8x64xf32>
    %39 = arith.truncf %38 : vector<8x64xf32> to vector<8x64xbf16>
    %c3 = arith.constant 3 : index
    %c0_19 = arith.constant 0 : index
    %c0_20 = arith.constant 0 : index
    %40 = vector.load %arg2[%c3, %c0_19, %c0_20] : memref<5x64x64xbf16, #tpu.memory_space<vmem>>, vector<1x64x64xbf16>
    %41 = vector.shape_cast %40 : vector<1x64x64xbf16> to vector<64x64xbf16>
    %cst_21 = arith.constant dense<0.000000e+00> : vector<8x64xf32>
    %42 = tpu.matmul %39, %41, %cst_21 {dimension_numbers = #tpu.dot_dimension_numbers<[1], [0], [0], [1], [0, 0, 1, 1], [], []>} : vector<8x64xbf16>, vector<64x64xbf16>, vector<8x64xf32> -> vector<8x64xf32>
    %c3_22 = arith.constant 3 : index
    %c0_23 = arith.constant 0 : index
    %43 = vector.load %arg3[%c3_22, %c0_23] : memref<8x64xf32, #tpu.memory_space<vmem>>, vector<1x64xf32>
    %44 = vector.broadcast %43 : vector<1x64xf32> to vector<8x64xf32>
    %45 = arith.addf %42, %44 : vector<8x64xf32>
    %46 = arith.negf %45 : vector<8x64xf32>
    %47 = math.exp %46 : vector<8x64xf32>
    %cst_24 = arith.constant 1.000000e+00 : f32
    %48 = vector.broadcast %cst_24 : f32 to vector<8x64xf32>
    %49 = arith.addf %48, %47 : vector<8x64xf32>
    %50 = arith.divf %48, %49 : vector<8x64xf32>
    %51 = arith.mulf %45, %50 : vector<8x64xf32>
    %52 = arith.truncf %51 : vector<8x64xf32> to vector<8x64xbf16>
    %c4 = arith.constant 4 : index
    %c0_25 = arith.constant 0 : index
    %c0_26 = arith.constant 0 : index
    %53 = vector.load %arg2[%c4, %c0_25, %c0_26] : memref<5x64x64xbf16, #tpu.memory_space<vmem>>, vector<1x64x64xbf16>
    %54 = vector.shape_cast %53 : vector<1x64x64xbf16> to vector<64x64xbf16>
    %cst_27 = arith.constant dense<0.000000e+00> : vector<8x64xf32>
    %55 = tpu.matmul %52, %54, %cst_27 {dimension_numbers = #tpu.dot_dimension_numbers<[1], [0], [0], [1], [0, 0, 1, 1], [], []>} : vector<8x64xbf16>, vector<64x64xbf16>, vector<8x64xf32> -> vector<8x64xf32>
    %c4_28 = arith.constant 4 : index
    %c0_29 = arith.constant 0 : index
    %56 = vector.load %arg3[%c4_28, %c0_29] : memref<8x64xf32, #tpu.memory_space<vmem>>, vector<1x64xf32>
    %57 = vector.broadcast %56 : vector<1x64xf32> to vector<8x64xf32>
    %58 = arith.addf %55, %57 : vector<8x64xf32>
    %c5 = arith.constant 5 : index
    %c0_30 = arith.constant 0 : index
    %59 = vector.load %arg3[%c5, %c0_30] : memref<8x64xf32, #tpu.memory_space<vmem>>, vector<1x64xf32>
    %c6 = arith.constant 6 : index
    %c0_31 = arith.constant 0 : index
    %60 = vector.load %arg3[%c6, %c0_31] : memref<8x64xf32, #tpu.memory_space<vmem>>, vector<1x64xf32>
    %61 = vector.broadcast %59 : vector<1x64xf32> to vector<8x64xf32>
    %62 = arith.subf %61, %58 : vector<8x64xf32>
    %cst_32 = arith.constant 0.000000e+00 : f32
    %63 = vector.broadcast %cst_32 : f32 to vector<8x64xf32>
    %64 = arith.maximumf %62, %63 : vector<8x64xf32>
    %65 = vector.broadcast %cst_32 : f32 to vector<8x64xf32>
    %66 = arith.subf %62, %65 : vector<8x64xf32>
    %67 = arith.cmpf one, %66, %66 : vector<8x64xf32>
    %68 = vector.broadcast %cst_32 : f32 to vector<8x64xf32>
    %69 = arith.addf %62, %68 : vector<8x64xf32>
    %70 = math.absf %66 : vector<8x64xf32>
    %cst_33 = arith.constant 0.000000e+00 : f32
    %71 = vector.broadcast %cst_33 : f32 to vector<8x64xf32>
    %72 = arith.subf %71, %70 : vector<8x64xf32>
    %73 = math.exp %72 : vector<8x64xf32>
    %74 = math.log1p %73 : vector<8x64xf32>
    %75 = arith.addf %64, %74 : vector<8x64xf32>
    %76 = arith.select %67, %69, %75 : vector<8x64xi1>, vector<8x64xf32>
    %77 = vector.broadcast %59 : vector<1x64xf32> to vector<8x64xf32>
    %78 = arith.subf %77, %76 : vector<8x64xf32>
    %79 = vector.broadcast %60 : vector<1x64xf32> to vector<8x64xf32>
    %80 = arith.subf %78, %79 : vector<8x64xf32>
    %cst_34 = arith.constant 0.000000e+00 : f32
    %81 = vector.broadcast %cst_34 : f32 to vector<8x64xf32>
    %82 = arith.maximumf %80, %81 : vector<8x64xf32>
    %83 = vector.broadcast %cst_34 : f32 to vector<8x64xf32>
    %84 = arith.subf %80, %83 : vector<8x64xf32>
    %85 = arith.cmpf one, %84, %84 : vector<8x64xf32>
    %86 = vector.broadcast %cst_34 : f32 to vector<8x64xf32>
    %87 = arith.addf %80, %86 : vector<8x64xf32>
    %88 = math.absf %84 : vector<8x64xf32>
    %cst_35 = arith.constant 0.000000e+00 : f32
    %89 = vector.broadcast %cst_35 : f32 to vector<8x64xf32>
    %90 = arith.subf %89, %88 : vector<8x64xf32>
    %91 = math.exp %90 : vector<8x64xf32>
    %92 = math.log1p %91 : vector<8x64xf32>
    %93 = arith.addf %82, %92 : vector<8x64xf32>
    %94 = arith.select %85, %87, %93 : vector<8x64xi1>, vector<8x64xf32>
    %95 = vector.broadcast %60 : vector<1x64xf32> to vector<8x64xf32>
    %96 = arith.addf %95, %94 : vector<8x64xf32>
    %97 = math.exp %96 : vector<8x64xf32>
    %98 = tpu.concatenate %58, %97 in 1 : vector<8x64xf32>, vector<8x64xf32> -> vector<8x128xf32>
    %c0_36 = arith.constant 0 : index
    %c0_37 = arith.constant 0 : index
    %99 = vector.load %arg4[%c0_36, %c0_37] : memref<8x128xf32, #tpu.memory_space<vmem>>, vector<8x128xf32>
    tpu.vector_store %arg4[%c0_36, %c0_37], %98 {strides = array<i32>} : memref<8x128xf32, #tpu.memory_space<vmem>>, vector<8x128xf32>,
    return
  }
  func.func @transform_0(%arg0: i32) -> (i32, i32) {
    %c0_i32 = arith.constant 0 : i32
    %c0_i32_0 = arith.constant 0 : i32
    return %arg0, %c0_i32 : i32, i32
  }
  func.func @transform_1(%arg0: i32) -> (i32, i32, i32) {
    %c0_i32 = arith.constant 0 : i32
    %c0_i32_0 = arith.constant 0 : i32
    %c0_i32_1 = arith.constant 0 : i32
    %c0_i32_2 = arith.constant 0 : i32
    return %c0_i32, %c0_i32_0, %c0_i32_1 : i32, i32, i32
  }
  func.func @transform_2(%arg0: i32) -> (i32, i32) {
    %c0_i32 = arith.constant 0 : i32
    %c0_i32_0 = arith.constant 0 : i32
    %c0_i32_1 = arith.constant 0 : i32
    return %c0_i32, %c0_i32_0 : i32, i32
  }
  func.func @transform_3(%arg0: i32) -> (i32, i32) {
    %c0_i32 = arith.constant 0 : i32
    %c0_i32_0 = arith.constant 0 : i32
    return %arg0, %c0_i32 : i32, i32
  }
}

</mosaic_0001>

<bundles_post_ra>
// kernel: ensemble_model_forward.1
= control target key start
LH: loop header
LB: loop body
LE: loop exit
PB: predicated region body
PF: predicated region fallthrough
CT: control target
= control target key end

     0   :  { %8 = vsyncpa [#allocation3], 0  ;;  %s726_s12 = smov [#allocation2]   ;;  %s829_s0 = inlined_call_operand.vmem [shape: bf16[8,64], index: 0, kind: input, shape index: {}]   ;;  %s830_s1 = inlined_call_operand.hbm [shape: bf16[5,64,64], index: 1, kind: input, shape index: {}]   ;;  %s831_s2 = inlined_call_operand.vmem [shape: f32[8,64], index: 2, kind: input, shape index: {}]   ;;  %s832_s3 = inlined_call_operand.vmem [shape: f32[8,128], index: 3, kind: output, shape index: {}]  }
   0x1   :  { %s16_s13 = sshll.u32 %s726_s12, 4  ;;  %s702_s16 = scalar_lea.hbm %s830_s1, 2560  ;;  %s17_s13 = int_to_ptr.vmem [resolvable:$true] %s16_s13 }
   0x2   :  { %p703_p0 = scmp.ne.s32.totalorder %s830_s1, %s702_s16  ;;  %p706_p1 = scmp.lt.u32.totalorder %s702_s16, %s830_s1 }
   0x4   :  { %p708_p2 = pnand %p706_p1, %p703_p0 }
   0x6   :  { %711 = shalt.err (!%p708_p2)
}
   0x7   :  { %s712_s21 = scalar_lea.vmem %s17_s13, 2560  ;;  %p717_p4 = scmp.lt.s32.totalorder %s17_s13, %s17_s13 }
   0x8   :  { %p713_p3 = scmp.ne.s32.totalorder %s17_s13, %s712_s21  ;;  %p718_p5 = scmp.lt.s32.totalorder %s712_s21, %s712_s21 }
   0xa   :  { %p719_p6 = por %p718_p5, %p717_p4 }
   0xc   :  { %p720_p7 = pnand %p719_p6, %p713_p3 }
   0xe   :  { %723 = shalt.err (!%p720_p7)
}
   0xf   :  { %s727_s22 = smov 64   ;;  %s728_s23 = smov 4  }
  0x10   :  { %22 = dma.hbm_to_vmem [thread:$0]  %s830_s1, 2560, %s17_s13, [#allocation3], %s727_s22, %s727_s22, %s728_s23  }
  0x11   :  { %724 = dma.done.wait [#allocation3], 2560  }
  0x12   :  { %725 = vsyncadd [#allocation3], 4294964736  ;;  %v729_v0 = vmov 0.0   ;;  %vm730_vm0 = vmmov 0   ;;  %v656_v1 = vld [vmem:[#allocation2] sm:$0xff]   ;;  %v657_v2 = vld [vmem:[#allocation2 + $0x8] sm:$0xff]  }
  0x13   :  { %591 = vmatprep.subr.bf16.mxu0 %v729_v0  ;;  %599 = vmatprep.mubr.msk.bf16.mxu0 %vm730_vm0, %v729_v0  ;;  %v658_v3 = vld [vmem:[#allocation2 + $0x10] sm:$0xff]   ;;  %vm67_vm1 = vcmask 523264   ;;  %v659_v4 = vld [vmem:[#allocation2 + $0x18] sm:$0xff]   ;;  %v29_v5 = vld [vmem:[%s829_s0] sm:$0xf] }
  0x14   :  { %603 = vmatprep.subr.bf16.mxu1 %v729_v0  ;;  %611 = vmatprep.mubr.msk.bf16.mxu1 %vm730_vm0, %v729_v0  ;;  %v660_v6 = vld [vmem:[#allocation2 + $0x20] sm:$0xff]   ;;  %v661_v7 = vld [vmem:[#allocation2 + $0x28] sm:$0xff]   ;;  %v662_v8 = vld [vmem:[#allocation2 + $0x30] sm:$0xff]  }
  0x15   :  { %592 = vmatpush3.bf16.msra.mxu0 %v656_v1  ;;  %604 = vmatpush3.bf16.msra.mxu1 %v660_v6  ;;  %v663_v9 = vld [vmem:[#allocation2 + $0x38] sm:$0xff]   ;;  %v530_v10 = vld [vmem:[%s831_s2] ss:$0 sm:$0xff]  ;;  %v665_v23 = vld [vmem:[#allocation2 + $0x48] sm:$0xff]  }
  0x16   :  { %593 = vmatprep.subr.bf16.mxu0 %v729_v0  ;;  %605 = vmatprep.subr.bf16.mxu1 %v729_v0  ;;  %v664_v22 = vld [vmem:[#allocation2 + $0x40] sm:$0xff]   ;;  %v666_v24 = vld [vmem:[#allocation2 + $0x50] sm:$0xff]   ;;  %v667_v25 = vld [vmem:[#allocation2 + $0x58] sm:$0xff]  }
  0x17   :  { %v537_v26 = vld [vmem:[%s831_s2 + $0x1] ss:$0 sm:$0xff]  ;;  %v669_v39 = vld [vmem:[#allocation2 + $0x68] sm:$0xff]   ;;  %v670_v40 = vld [vmem:[#allocation2 + $0x70] sm:$0xff]  }
  0x18   :  { %v668_v38 = vld [vmem:[#allocation2 + $0x60] sm:$0xff]   ;;  %v671_v41 = vld [vmem:[#allocation2 + $0x78] sm:$0xff]   ;;  %v673_v55 = vld [vmem:[#allocation2 + $0x88] sm:$0xff]  }
  0x19   :  { %594 = vmatpush3.bf16.msra.mxu0 %v657_v2  ;;  %606 = vmatpush3.bf16.msra.mxu1 %v661_v7  ;;  %v544_v42 = vld [vmem:[%s831_s2 + $0x2] ss:$0 sm:$0xff]  ;;  %v674_v56 = vld [vmem:[#allocation2 + $0x90] sm:$0xff]   ;;  %v675_v57 = vld [vmem:[#allocation2 + $0x98] sm:$0xff]  }
  0x1a   :  { %595 = vmatprep.subr.bf16.mxu0 %v729_v0  ;;  %607 = vmatprep.subr.bf16.mxu1 %v729_v0  ;;  %v672_v54 = vld [vmem:[#allocation2 + $0x80] sm:$0xff]  }
  0x1b   :  { %v551_v58 = vld [vmem:[%s831_s2 + $0x3] ss:$0 sm:$0xff] }
  0x1d   :  { %596 = vmatpush3.bf16.msra.mxu0 %v658_v3  ;;  %608 = vmatpush3.bf16.msra.mxu1 %v662_v8  ;;  %v564_v8 = vld [vmem:[%s831_s2 + $0x5] ss:$0 sm:$0xff] }
  0x1e   :  { %597 = vmatprep.subr.bf16.mxu0 %v729_v0  ;;  %609 = vmatprep.subr.bf16.mxu1 %v729_v0 }
  0x21   :  { %598 = vmatpush3.bf16.msra.mxu0 %v659_v4  ;;  %610 = vmatpush3.bf16.msra.mxu1 %v663_v9 }
  0x22   :  { %615 = vmatprep.subr.bf16.mxu0 %v729_v0  ;;  %627 = vmatprep.subr.bf16.mxu1 %v729_v0 }
  0x24   :  { %600 = vmatmul.mubr.msk.bf16.vlgmr.msra.gmra.mrb[0].mxu0 %vm67_vm1, %v29_v5 }
  0x25   :  { %623 = vmatprep.mubr.msk.bf16.mxu0 %vm730_vm0, %v729_v0  ;;  %616 = vmatpush3.bf16.msra.mxu0 %v664_v22 }
  0x26   :  { %617 = vmatprep.subr.bf16.mxu0 %v729_v0 }
  0x29   :  { %618 = vmatpush3.bf16.msra.mxu0 %v665_v23 }
  0x2a   :  { %619 = vmatprep.subr.bf16.mxu0 %v729_v0 }
  0x2d   :  { %620 = vmatpush3.bf16.msra.mxu0 %v666_v24 }
  0x2e   :  { %621 = vmatprep.subr.bf16.mxu0 %v729_v0 }
  0x31   :  { %622 = vmatpush3.bf16.msra.mxu0 %v667_v25 }
  0x32   :  { %639 = vmatprep.subr.bf16.mxu0 %v729_v0 }
  0xf7   :  { %v105_v11 = vpop.f32.mrb[0].mxu0 }
  0xf8   :  { %v106_v12 = vadd.f32 %v530_v10, %v105_v11  ;;  %v601_v13 = vpop.f32.mrb[1].mxu0 }
  0xf9   :  { %v108_v14 = vpop.f32.mrb[2].mxu0 }
  0xfa   :  { %v536_v15 = vmul.f32 -1.442695, %v106_v12  ;;  %v602_v16 = vpop.f32.mrb[3].mxu0 }
  0xfc   :  { %676 = vpow2.f32 %v536_v15 }
 0x106   :  { %v677_v17 = vpop.eup %676 }
 0x107   :  { %v114_v18 = vadd.f32 1.0, %v677_v17 }
 0x109   :  { %678 = vrcp.f32 %v114_v18 }
 0x113   :  { %v679_v19 = vpop.eup %678 }
 0x114   :  { %v117_v20 = vmul.f32 %v679_v19, %v106_v12 }
 0x116   :  { %v118_v21 = vpack.c.bf16 %v117_v20, %v117_v20 }
 0x118   :  { %612 = vmatmul.mubr.msk.bf16.vlgmr.msra.gmra.mrb[0].mxu1 %vm67_vm1, %v118_v21 }
 0x119   :  { %635 = vmatprep.mubr.msk.bf16.mxu1 %vm730_vm0, %v729_v0  ;;  %628 = vmatpush3.bf16.msra.mxu1 %v668_v38 }
 0x11a   :  { %629 = vmatprep.subr.bf16.mxu1 %v729_v0 }
 0x11d   :  { %630 = vmatpush3.bf16.msra.mxu1 %v669_v39 }
 0x11e   :  { %631 = vmatprep.subr.bf16.mxu1 %v729_v0 }
 0x121   :  { %632 = vmatpush3.bf16.msra.mxu1 %v670_v40 }
 0x122   :  { %633 = vmatprep.subr.bf16.mxu1 %v729_v0 }
 0x125   :  { %634 = vmatpush3.bf16.msra.mxu1 %v671_v41 }
 0x1eb   :  { %v194_v27 = vpop.f32.mrb[0].mxu1 }
 0x1ec   :  { %v195_v28 = vadd.f32 %v537_v26, %v194_v27  ;;  %v613_v29 = vpop.f32.mrb[1].mxu1 }
 0x1ed   :  { %v197_v30 = vpop.f32.mrb[2].mxu1  ;;  %v565_v29 = vld [vmem:[%s831_s2 + $0x6] ss:$0 sm:$0xff] }
 0x1ee   :  { %v543_v31 = vmul.f32 -1.442695, %v195_v28  ;;  %v614_v32 = vpop.f32.mrb[3].mxu1 }
 0x1f0   :  { %680 = vpow2.f32 %v543_v31 }
 0x1fa   :  { %v681_v33 = vpop.eup %680 }
 0x1fb   :  { %v203_v34 = vadd.f32 1.0, %v681_v33 }
 0x1fd   :  { %682 = vrcp.f32 %v203_v34 }
 0x207   :  { %v683_v35 = vpop.eup %682 }
 0x208   :  { %v206_v36 = vmul.f32 %v683_v35, %v195_v28 }
 0x20a   :  { %v207_v37 = vpack.c.bf16 %v206_v36, %v206_v36 }
 0x20c   :  { %624 = vmatmul.mubr.msk.bf16.vlgmr.msra.gmra.mrb[4].mxu0 %vm67_vm1, %v207_v37 }
 0x20d   :  { %647 = vmatprep.mubr.msk.bf16.mxu0 %vm730_vm0, %v729_v0  ;;  %640 = vmatpush3.bf16.msra.mxu0 %v672_v54 }
 0x20e   :  { %641 = vmatprep.subr.bf16.mxu0 %v729_v0 }
 0x211   :  { %642 = vmatpush3.bf16.msra.mxu0 %v673_v55 }
 0x212   :  { %643 = vmatprep.subr.bf16.mxu0 %v729_v0 }
 0x215   :  { %644 = vmatpush3.bf16.msra.mxu0 %v674_v56 }
 0x216   :  { %645 = vmatprep.subr.bf16.mxu0 %v729_v0  ;;  %v558_v0 = vld [vmem:[%s831_s2 + $0x4] ss:$0 sm:$0xff] }
 0x219   :  { %646 = vmatpush3.bf16.msra.mxu0 %v675_v57 }
 0x2df   :  { %v283_v43 = vpop.f32.mrb[4].mxu0 }
 0x2e0   :  { %v284_v44 = vadd.f32 %v544_v42, %v283_v43  ;;  %v625_v45 = vpop.f32.mrb[5].mxu0 }
 0x2e1   :  { %v286_v46 = vpop.f32.mrb[6].mxu0 }
 0x2e2   :  { %v550_v47 = vmul.f32 -1.442695, %v284_v44  ;;  %v626_v48 = vpop.f32.mrb[7].mxu0 }
 0x2e4   :  { %684 = vpow2.f32 %v550_v47 }
 0x2ee   :  { %v685_v49 = vpop.eup %684 }
 0x2ef   :  { %v292_v50 = vadd.f32 1.0, %v685_v49 }
 0x2f1   :  { %686 = vrcp.f32 %v292_v50 }
 0x2fb   :  { %v687_v51 = vpop.eup %686 }
 0x2fc   :  { %v295_v52 = vmul.f32 %v687_v51, %v284_v44 }
 0x2fe   :  { %v296_v53 = vpack.c.bf16 %v295_v52, %v295_v52 }
 0x300   :  { %636 = vmatmul.mubr.msk.bf16.vlgmr.msra.gmra.mrb[4].mxu1 %vm67_vm1, %v296_v53 }
 0x3d3   :  { %v372_v59 = vpop.f32.mrb[4].mxu1 }
 0x3d4   :  { %v373_v60 = vadd.f32 %v551_v58, %v372_v59  ;;  %v637_v61 = vpop.f32.mrb[5].mxu1 }
 0x3d5   :  { %v375_v62 = vpop.f32.mrb[6].mxu1 }
 0x3d6   :  { %v557_v63 = vmul.f32 -1.442695, %v373_v60  ;;  %v638_v1 = vpop.f32.mrb[7].mxu1 }
 0x3d8   :  { %688 = vpow2.f32 %v557_v63 }
 0x3e2   :  { %v689_v2 = vpop.eup %688 }
 0x3e3   :  { %v381_v3 = vadd.f32 1.0, %v689_v2 }
 0x3e5   :  { %690 = vrcp.f32 %v381_v3 }
 0x3ef   :  { %v691_v4 = vpop.eup %690 }
 0x3f0   :  { %v384_v5 = vmul.f32 %v691_v4, %v373_v60 }
 0x3f2   :  { %v385_v6 = vpack.c.bf16 %v384_v5, %v384_v5 }
 0x3f4   :  { %648 = vmatmul.mubr.msk.bf16.vlgmr.msra.gmra.mrb[8].mxu0 %vm67_vm1, %v385_v6 }
 0x4c7   :  { %v461_v7 = vpop.f32.mrb[8].mxu0 }
 0x4c8   :  { %v462_v9 = vadd.f32 %v558_v0, %v461_v7  ;;  %v649_v10 = vpop.f32.mrb[9].mxu0 }
 0x4c9   :  { %v464_v11 = vpop.f32.mrb[10].mxu0 }
 0x4ca   :  { %v473_v12 = vsub.f32 %v564_v8, %v462_v9  ;;  %v650_v13 = vpop.f32.mrb[11].mxu0 }
 0x4cc   :  { %v477_v14 = vand.u32 2147483647, %v473_v12  ;;  %v474_v25 = vmax.f32 %v473_v12, 0.0  ;;  %vm475_vm3 = vcmp.ne.f32.partialorder %v473_v12, %v473_v12 }
 0x4ce   :  { %v478_v15 = vsub.f32 0.0, %v477_v14 }
 0x4d0   :  { %v479_v16 = vmul.f32 1.442695, %v478_v15 }
 0x4d2   :  { %692 = vpow2.f32 %v479_v16 }
 0x4dc   :  { %v693_v17 = vpop.eup %692 }
 0x4dd   :  { %v481_v18 = vadd.f32 1.0, %v693_v17  ;;  %v484_v19 = vmul.f32 -0.5, %v693_v17  ;;  %v487_v21 = vand.u32 2147483647, %v693_v17 }
 0x4df   :  { %694 = vlog2.f32 %v481_v18  ;;  %v485_v20 = vadd.f32 1.0, %v484_v19  ;;  %vm488_vm2 = vcmp.lt.f32.partialorder %v487_v21, 0.0004427343 }
 0x4e1   :  { %v486_v24 = vmul.f32 %v693_v17, %v485_v20 }
 0x4e9   :  { %v695_v22 = vpop.eup %694 }
 0x4ea   :  { %v483_v23 = vmul.f32 0.6931472, %v695_v22 }
 0x4ec   :  { %v489_v26 = vsel %vm488_vm2, %v486_v24, %v483_v23 }
 0x4ed   :  { %v490_v27 = vadd.f32 %v489_v26, %v474_v25 }
 0x4ef   :  { %v491_v28 = vsel %vm475_vm3, %v473_v12, %v490_v27 }
 0x4f0   :  { %v492_v30 = vsub.f32 %v564_v8, %v491_v28 }
 0x4f2   :  { %v497_v31 = vsub.f32 %v492_v30, %v565_v29 }
 0x4f4   :  { %v501_v32 = vand.u32 2147483647, %v497_v31  ;;  %v498_v43 = vmax.f32 %v497_v31, 0.0  ;;  %vm499_vm5 = vcmp.ne.f32.partialorder %v497_v31, %v497_v31 }
 0x4f6   :  { %v502_v33 = vsub.f32 0.0, %v501_v32 }
 0x4f8   :  { %v503_v34 = vmul.f32 1.442695, %v502_v33 }
 0x4fa   :  { %696 = vpow2.f32 %v503_v34 }
 0x504   :  { %v697_v35 = vpop.eup %696 }
 0x505   :  { %v505_v36 = vadd.f32 1.0, %v697_v35  ;;  %v508_v37 = vmul.f32 -0.5, %v697_v35  ;;  %v511_v39 = vand.u32 2147483647, %v697_v35 }
 0x507   :  { %698 = vlog2.f32 %v505_v36  ;;  %v509_v38 = vadd.f32 1.0, %v508_v37  ;;  %vm512_vm4 = vcmp.lt.f32.partialorder %v511_v39, 0.0004427343 }
 0x509   :  { %v510_v42 = vmul.f32 %v697_v35, %v509_v38 }
 0x511   :  { %v699_v40 = vpop.eup %698 }
 0x512   :  { %v507_v41 = vmul.f32 0.6931472, %v699_v40 }
 0x514   :  { %v513_v44 = vsel %vm512_vm4, %v510_v42, %v507_v41 }
 0x515   :  { %v514_v45 = vadd.f32 %v513_v44, %v498_v43 }
 0x517   :  { %v515_v46 = vsel %vm499_vm5, %v497_v31, %v514_v45 }
 0x518   :  { %v516_v47 = vadd.f32 %v565_v29, %v515_v46 }
 0x51a   :  { %v517_v48 = vmul.f32 1.442695, %v516_v47 }
 0x51c   :  { %700 = vpow2.f32 %v517_v48 }
 0x526   :  { %v701_v49 = vpop.eup %700 }
 0x527   :  { %520 = vrot.lane.b32.xlu0 %v701_v49, %s727_s22 }
 0x599   :  { %v521_v50 = vpop.permute.xlu0 %520 }
 0x59a   :  { %v523_v51 = vsel %vm67_vm1, %v462_v9, %v521_v50 }
 0x59b   :  { %524 = vst [vmem:[%s832_s3] sm:$0xff] %v523_v51 }
 0x59c   :  { %529 = vsyncpa [#allocation3], 1 }

</bundles_post_ra>
